<compile_context>
chip_gen: v5e
topology: v5e:2x2
jax: 0.10.0
libtpu: 0.0.40
codegen_flags: <defaults>
</compile_context>

<pallas_src>
import functools

import jax
import jax.numpy as jnp
import numpy as np
from jax.experimental import pallas as pl
from jax.experimental.pallas import tpu as pltpu

# Module-level "globals" of the original script (threshold / lamda / ROI box),
# defined deterministically here.
THRESHOLD = 0.5
LAMDA = 0.5
AVG_X, AVG_Y, AVG_W, AVG_H = 8, 8, 8, 8  # bottom-right ROI of a 16x16 CAM

_LANE = 128  # lane width of the per-sample-loss output block


def _round_up(x, m):
    return ((x + m - 1) // m) * m


def _make_loss_kernel(C, HW, threshold, lamda):
    inv_c = 1.0 / float(C)

    def kernel(img_ref, logit_ref, label_ref, masks_ref, loss_ref):
        TB, NC = logit_ref.shape

        logits = logit_ref[...].astype(jnp.float32)           # (TB, NC)
        labels = label_ref[...]                               # (TB, 1) int32

        # ---- per-sample cross entropy:  logsumexp(logits) - logits[label] ----
        m = jnp.max(logits, axis=-1, keepdims=True)            # (TB, 1)
        lse = m + jnp.log(jnp.sum(jnp.exp(logits - m), axis=-1, keepdims=True))
        cls_ids = jax.lax.broadcasted_iota(jnp.int32, (TB, NC), 1)
        picked = jnp.sum(jnp.where(cls_ids == labels, logits, 0.0),
                         axis=-1, keepdims=True)
        loss_ce = lse - picked                                  # (TB, 1)

        # ---- surrogate Grad-CAM: channel-mean saliency, min-max scaled to [0,1] ----
        # TODO(synk): the real GradCAM needs the checkpointed ResNet50 ('best_model.pt')
        # plus backprop hooks; a deterministic channel-mean saliency map stands in here.
        # Lane-dense layout: images arrive as (TB, C*HW); the channel reduction is a sum
        # of C static, 128-aligned lane slices (cheap VPU adds, no sublane-padded C axis).
        cam = img_ref[:, 0:HW].astype(jnp.float32)              # (TB, HW)
        for c in range(1, C):
            cam = cam + img_ref[:, c * HW:(c + 1) * HW].astype(jnp.float32)
        cam = cam * inv_c
        cam_min = jnp.min(cam, axis=-1, keepdims=True)
        cam_max = jnp.max(cam, axis=-1, keepdims=True)
        cam = (cam - cam_min) / (cam_max - cam_min + 1e-7)

        # ---- region ratios via precomputed, count-normalized masks ----
        red = (cam > threshold).astype(jnp.float32)             # (TB, HW)
        ratio_br = jnp.sum(red * masks_ref[0:1, :], axis=-1, keepdims=True)
        ratio_top = jnp.sum(red * masks_ref[1:2, :], axis=-1, keepdims=True)

        loss_att = jnp.where(labels == 1, 1.0 - ratio_br,
                             jnp.where(labels == 2, 1.0 - ratio_top, 0.0))  # (TB, 1)

        loss = lamda * loss_ce + (1.0 - lamda) * loss_att        # (TB, 1)
        # Lane-dense (unmasked) store: broadcast each sample's loss across 128 lanes;
        # the wrapper reads column 0.
        loss_ref[...] = jnp.broadcast_to(loss, loss_ref.shape)

    return kernel


@functools.partial(jax.jit, static_argnames=("tile_b",))
def custom_loss_nep(images, outputs, labels, predictions, *, tile_b=None):
    """Pallas implementation of CustomLoss_nep.forward.

    images:      (B, C, H, W) float32, NCHW
    outputs:     (B, NUM_CLASSES) float32 logits
    labels:      (B,) int32 class ids in {0, 1, 2}
    predictions: (B,) int32 predicted class ids (only used to pick the GradCAM target
                 in the original code; the surrogate CAM does not depend on it).
    tile_b:      optional batch tile override (multiple of 16). Default: largest tile
                 whose double-buffered bf16 image block fits a conservative VMEM budget.
    """
    del predictions  # surrogate CAM is class-independent
    B, C, H, W = images.shape
    NC = outputs.shape[-1]
    HW = H * W

    # ---- bandwidth: ship images as bf16, lane-dense (B, C*HW) ----
    img_flat = images.reshape(B, C * HW).astype(jnp.bfloat16)
    logits = outputs.astype(jnp.float32)
    labels2d = labels.astype(jnp.int32).reshape(B, 1)

    # ---- trace-time constant region masks, pre-normalized by region pixel count ----
    idx = np.arange(HW)
    rows, cols = idx // W, idx % W
    mask_br = ((rows >= AVG_Y) & (rows < AVG_Y + AVG_H) &
               (cols >= AVG_X) & (cols < AVG_X + AVG_W)).astype(np.float32)
    mask_top = (rows < (H // 2)).astype(np.float32)
    masks = jnp.asarray(np.stack([mask_br / mask_br.sum(),
                                  mask_top / mask_top.sum()], axis=0))   # (2, HW)

    # ---- batch tile: biggest multiple of 16 whose double-buffered image tile fits
    #      ~8 MiB (safe on v5e/v6e/v7x scoped-VMEM defaults) ----
    bytes_per_sample = C * HW * 2  # bf16
    if tile_b is None:
        tile_b = (8 * 1024 * 1024) // (2 * bytes_per_sample)
    TB = max(16, (int(tile_b) // 16) * 16)
    TB = min(TB, 256, _round_up(B, 16))
    B_pad = _round_up(B, TB)

    if B_pad != B:
        pad = B_pad - B
        img_flat = jnp.pad(img_flat, ((0, pad), (0, 0)))
        logits = jnp.pad(logits, ((0, pad), (0, 0)))
        labels2d = jnp.pad(labels2d, ((0, pad), (0, 0)))

    kernel = _make_loss_kernel(C, HW, THRESHOLD, LAMDA)

    per_sample = pl.pallas_call(
        kernel,
        out_shape=jax.ShapeDtypeStruct((B_pad, _LANE), jnp.float32),
        grid=(B_pad // TB,),
        in_specs=[
            pl.BlockSpec((TB, C * HW), lambda i: (i, 0)),   # images (bf16, lane-dense)
            pl.BlockSpec((TB, NC), lambda i: (i, 0)),       # logits
            pl.BlockSpec((TB, 1), lambda i: (i, 0)),        # labels
            pl.BlockSpec((2, HW), lambda i: (0, 0)),        # constant normalized masks
        ],
        out_specs=pl.BlockSpec((TB, _LANE), lambda i: (i, 0)),
        compiler_params=pltpu.CompilerParams(
            dimension_semantics=("parallel",),
            vmem_limit_bytes=32 * 1024 * 1024,
        ),
    )(img_flat, logits, labels2d, masks)

    return jnp.mean(per_sample[:B, 0])  # torch.mean(losses)


def _reference_loss(images_f32, logits, labels):
    """NumPy reference mirroring the per-sample PyTorch loop (surrogate CAM).

    `images_f32` must already be the bf16-rounded values the kernel consumes,
    upcast back to float32, so the >threshold comparisons are apples-to-apples.
    """
    images_f32 = np.asarray(images_f32, np.float32)
    logits = np.asarray(logits, np.float32)
    labels = np.asarray(labels)
    B, C, H, W = images_f32.shape
    losses = []
    for i in range(B):
        z = logits[i].astype(np.float64)
        m = z.max()
        lse = m + np.log(np.exp(z - m).sum())
        loss_ce = lse - z[labels[i]]

        # channel-mean CAM, same op order / dtype as the kernel
        cam = images_f32[i, 0].astype(np.float32)
        for c in range(1, C):
            cam = cam + images_f32[i, c].astype(np.float32)
        cam = cam * np.float32(1.0 / C)
        cam_min = cam.min()
        cam_max = cam.max()
        cam = (cam - cam_min) / (cam_max - cam_min + np.float32(1e-7))

        if labels[i] == 0:
            loss_att = 0.0
        elif labels[i] == 1:
            region = cam[AVG_Y:AVG_Y + AVG_H, AVG_X:AVG_X + AVG_W]
            loss_att = 1.0 - float((region > THRESHOLD).mean())
        else:
            region = cam[:H // 2, :]
            loss_att = 1.0 - float((region > THRESHOLD).mean())
        losses.append(LAMDA * loss_ce + (1.0 - LAMDA) * loss_att)
    return np.float32(np.mean(losses))


if __name__ == "__main__":
    B, C, H, W = 32, 4, 16, 16
    NUM_CLASSES = 3

    key = jax.random.PRNGKey(0)
    k_img, k_out = jax.random.split(key)
    images = jax.random.normal(k_img, (B, C, H, W), dtype=jnp.float32)
    outputs = jax.random.normal(k_out, (B, NUM_CLASSES), dtype=jnp.float32)
    labels = (jnp.arange(B, dtype=jnp.int32) % 3)            # covers all three branches
    predictions = jnp.argmax(outputs, axis=-1).astype(jnp.int32)

    # tile_b=16 -> grid of 2 batch tiles: exercises the pipelined / parallel grid path.
    loss = custom_loss_nep(images, outputs, labels, predictions, tile_b=16)
    loss = jax.block_until_ready(loss)

    # Reference uses the same bf16-rounded image values the kernel consumes.
    images_bf16_as_f32 = np.asarray(images.astype(jnp.bfloat16).astype(jnp.float32))
    ref = _reference_loss(images_bf16_as_f32, np.asarray(outputs), np.asarray(labels))
    np.testing.assert_allclose(np.asarray(loss), ref, rtol=1e-3, atol=1e-3)

    print("KERNEL_OK")
</pallas_src>

<mosaic_0001>
module attributes {stable_mosaic.version = 11 : i64} {
  func.func @kernel(%arg0: i32, %arg1: memref<16x1024xbf16, #tpu.memory_space<vmem>>, %arg2: memref<16x3xf32, #tpu.memory_space<vmem>>, %arg3: memref<16x1xi32, #tpu.memory_space<vmem>>, %arg4: memref<2x256xf32, #tpu.memory_space<vmem>>, %arg5: memref<16x128xf32, #tpu.memory_space<vmem>>) attributes {dimension_semantics = [#tpu.dimension_semantics<parallel>], iteration_bounds = array<i64: 2>, scalar_prefetch = 0 : i64, scratch_operands = 0 : i64, tpu.core_type = #tpu.core_type<tc>, window_params = [{transform_indices = @transform_0, window_bounds = array<i64: 16, 1024>}, {transform_indices = @transform_1, window_bounds = array<i64: 16, 3>}, {transform_indices = @transform_2, window_bounds = array<i64: 16, 1>}, {pipeline_mode = #tpu.pipeline_mode<synchronous>, transform_indices = @transform_3, window_bounds = array<i64: 2, 256>}, {transform_indices = @transform_4, window_bounds = array<i64: 16, 128>}]} {
    %c0 = arith.constant 0 : index
    %c0_0 = arith.constant 0 : index
    %0 = vector.load %arg2[%c0, %c0_0] : memref<16x3xf32, #tpu.memory_space<vmem>>, vector<16x3xf32>
    %c0_1 = arith.constant 0 : index
    %c0_2 = arith.constant 0 : index
    %1 = vector.load %arg3[%c0_1, %c0_2] : memref<16x1xi32, #tpu.memory_space<vmem>>, vector<16x1xi32>
    %cst = arith.constant dense<0xFF800000> : vector<16xf32>
    %2 = vector.multi_reduction <maximumf>, %0, %cst [1] : vector<16x3xf32> to vector<16xf32>
    %3 = vector.shape_cast %2 : vector<16xf32> to vector<16x1xf32>
    %4 = vector.broadcast %3 : vector<16x1xf32> to vector<16x3xf32>
    %5 = arith.subf %0, %4 : vector<16x3xf32>
    %6 = math.exp %5 : vector<16x3xf32>
    %cst_3 = arith.constant dense<0.000000e+00> : vector<16xf32>
    %7 = vector.multi_reduction <add>, %6, %cst_3 [1] : vector<16x3xf32> to vector<16xf32>
    %8 = vector.shape_cast %7 : vector<16xf32> to vector<16x1xf32>
    %9 = math.log %8 : vector<16x1xf32>
    %10 = arith.addf %3, %9 : vector<16x1xf32>
    %11 = tpu.iota {dimensions = array<i32: 1>} : vector<16x3xi32>
    %12 = vector.broadcast %1 : vector<16x1xi32> to vector<16x3xi32>
    %13 = arith.cmpi eq, %11, %12 : vector<16x3xi32>
    %cst_4 = arith.constant 0.000000e+00 : f32
    %14 = vector.broadcast %cst_4 : f32 to vector<16x3xf32>
    %15 = arith.select %13, %0, %14 : vector<16x3xi1>, vector<16x3xf32>
    %cst_5 = arith.constant dense<0.000000e+00> : vector<16xf32>
    %16 = vector.multi_reduction <add>, %15, %cst_5 [1] : vector<16x3xf32> to vector<16xf32>
    %17 = vector.shape_cast %16 : vector<16xf32> to vector<16x1xf32>
    %18 = arith.subf %10, %17 : vector<16x1xf32>
    %c0_6 = arith.constant 0 : index
    %c0_7 = arith.constant 0 : index
    %19 = vector.load %arg1[%c0_6, %c0_7] : memref<16x1024xbf16, #tpu.memory_space<vmem>>, vector<16x256xbf16>
    %20 = arith.extf %19 : vector<16x256xbf16> to vector<16x256xf32>
    %c0_8 = arith.constant 0 : index
    %c256 = arith.constant 256 : index
    %21 = vector.load %arg1[%c0_8, %c256] : memref<16x1024xbf16, #tpu.memory_space<vmem>>, vector<16x256xbf16>
    %22 = arith.extf %21 : vector<16x256xbf16> to vector<16x256xf32>
    %23 = arith.addf %20, %22 : vector<16x256xf32>
    %c0_9 = arith.constant 0 : index
    %c512 = arith.constant 512 : index
    %24 = vector.load %arg1[%c0_9, %c512] : memref<16x1024xbf16, #tpu.memory_space<vmem>>, vector<16x256xbf16>
    %25 = arith.extf %24 : vector<16x256xbf16> to vector<16x256xf32>
    %26 = arith.addf %23, %25 : vector<16x256xf32>
    %c0_10 = arith.constant 0 : index
    %c768 = arith.constant 768 : index
    %27 = vector.load %arg1[%c0_10, %c768] : memref<16x1024xbf16, #tpu.memory_space<vmem>>, vector<16x256xbf16>
    %28 = arith.extf %27 : vector<16x256xbf16> to vector<16x256xf32>
    %29 = arith.addf %26, %28 : vector<16x256xf32>
    %cst_11 = arith.constant 2.500000e-01 : f32
    %30 = vector.broadcast %cst_11 : f32 to vector<16x256xf32>
    %31 = arith.mulf %29, %30 : vector<16x256xf32>
    %cst_12 = arith.constant dense<0x7F800000> : vector<16xf32>
    %32 = vector.multi_reduction <minimumf>, %31, %cst_12 [1] : vector<16x256xf32> to vector<16xf32>
    %33 = vector.shape_cast %32 : vector<16xf32> to vector<16x1xf32>
    %cst_13 = arith.constant dense<0xFF800000> : vector<16xf32>
    %34 = vector.multi_reduction <maximumf>, %31, %cst_13 [1] : vector<16x256xf32> to vector<16xf32>
    %35 = vector.shape_cast %34 : vector<16xf32> to vector<16x1xf32>
    %36 = vector.broadcast %33 : vector<16x1xf32> to vector<16x256xf32>
    %37 = arith.subf %31, %36 : vector<16x256xf32>
    %38 = arith.subf %35, %33 : vector<16x1xf32>
    %cst_14 = arith.constant 1.000000e-07 : f32
    %39 = vector.broadcast %cst_14 : f32 to vector<16x1xf32>
    %40 = arith.addf %38, %39 : vector<16x1xf32>
    %41 = vector.broadcast %40 : vector<16x1xf32> to vector<16x256xf32>
    %42 = arith.divf %37, %41 : vector<16x256xf32>
    %cst_15 = arith.constant 5.000000e-01 : f32
    %43 = vector.broadcast %cst_15 : f32 to vector<16x256xf32>
    %44 = arith.cmpf ogt, %42, %43 : vector<16x256xf32>
    %45 = arith.extui %44 : vector<16x256xi1> to vector<16x256xi32>
    %46 = arith.sitofp %45 : vector<16x256xi32> to vector<16x256xf32>
    %c0_16 = arith.constant 0 : index
    %c0_17 = arith.constant 0 : index
    %47 = vector.load %arg4[%c0_16, %c0_17] : memref<2x256xf32, #tpu.memory_space<vmem>>, vector<1x256xf32>
    %48 = vector.broadcast %47 : vector<1x256xf32> to vector<16x256xf32>
    %49 = arith.mulf %46, %48 : vector<16x256xf32>
    %cst_18 = arith.constant dense<0.000000e+00> : vector<16xf32>
    %50 = vector.multi_reduction <add>, %49, %cst_18 [1] : vector<16x256xf32> to vector<16xf32>
    %51 = vector.shape_cast %50 : vector<16xf32> to vector<16x1xf32>
    %c1 = arith.constant 1 : index
    %c0_19 = arith.constant 0 : index
    %52 = vector.load %arg4[%c1, %c0_19] : memref<2x256xf32, #tpu.memory_space<vmem>>, vector<1x256xf32>
    %53 = vector.broadcast %52 : vector<1x256xf32> to vector<16x256xf32>
    %54 = arith.mulf %46, %53 : vector<16x256xf32>
    %cst_20 = arith.constant dense<0.000000e+00> : vector<16xf32>
    %55 = vector.multi_reduction <add>, %54, %cst_20 [1] : vector<16x256xf32> to vector<16xf32>
    %56 = vector.shape_cast %55 : vector<16xf32> to vector<16x1xf32>
    %c1_i32 = arith.constant 1 : i32
    %57 = vector.broadcast %c1_i32 : i32 to vector<16x1xi32>
    %58 = arith.cmpi eq, %1, %57 : vector<16x1xi32>
    %cst_21 = arith.constant 1.000000e+00 : f32
    %59 = vector.broadcast %cst_21 : f32 to vector<16x1xf32>
    %60 = arith.subf %59, %51 : vector<16x1xf32>
    %c2_i32 = arith.constant 2 : i32
    %61 = vector.broadcast %c2_i32 : i32 to vector<16x1xi32>
    %62 = arith.cmpi eq, %1, %61 : vector<16x1xi32>
    %cst_22 = arith.constant 1.000000e+00 : f32
    %63 = vector.broadcast %cst_22 : f32 to vector<16x1xf32>
    %64 = arith.subf %63, %56 : vector<16x1xf32>
    %cst_23 = arith.constant 0.000000e+00 : f32
    %65 = vector.broadcast %cst_23 : f32 to vector<16x1xf32>
    %66 = arith.select %62, %64, %65 : vector<16x1xi1>, vector<16x1xf32>
    %67 = arith.select %58, %60, %66 : vector<16x1xi1>, vector<16x1xf32>
    %cst_24 = arith.constant 5.000000e-01 : f32
    %68 = vector.broadcast %cst_24 : f32 to vector<16x1xf32>
    %69 = arith.mulf %68, %18 : vector<16x1xf32>
    %cst_25 = arith.constant 5.000000e-01 : f32
    %70 = vector.broadcast %cst_25 : f32 to vector<16x1xf32>
    %71 = arith.mulf %70, %67 : vector<16x1xf32>
    %72 = arith.addf %69, %71 : vector<16x1xf32>
    %73 = vector.shape_cast %72 : vector<16x1xf32> to vector<16x1xf32>
    %74 = vector.broadcast %73 : vector<16x1xf32> to vector<16x128xf32>
    %c0_26 = arith.constant 0 : index
    %c0_27 = arith.constant 0 : index
    %75 = vector.load %arg5[%c0_26, %c0_27] : memref<16x128xf32, #tpu.memory_space<vmem>>, vector<16x128xf32>
    tpu.vector_store %arg5[%c0_26, %c0_27], %74 {strides = array<i32>} : memref<16x128xf32, #tpu.memory_space<vmem>>, vector<16x128xf32>,
    return
  }
  func.func @transform_0(%arg0: i32) -> (i32, i32) {
    %c0_i32 = arith.constant 0 : i32
    %c0_i32_0 = arith.constant 0 : i32
    return %arg0, %c0_i32 : i32, i32
  }
  func.func @transform_1(%arg0: i32) -> (i32, i32) {
    %c0_i32 = arith.constant 0 : i32
    %c0_i32_0 = arith.constant 0 : i32
    return %arg0, %c0_i32 : i32, i32
  }
  func.func @transform_2(%arg0: i32) -> (i32, i32) {
    %c0_i32 = arith.constant 0 : i32
    %c0_i32_0 = arith.constant 0 : i32
    return %arg0, %c0_i32 : i32, i32
  }
  func.func @transform_3(%arg0: i32) -> (i32, i32) {
    %c0_i32 = arith.constant 0 : i32
    %c0_i32_0 = arith.constant 0 : i32
    %c0_i32_1 = arith.constant 0 : i32
    return %c0_i32, %c0_i32_0 : i32, i32
  }
  func.func @transform_4(%arg0: i32) -> (i32, i32) {
    %c0_i32 = arith.constant 0 : i32
    %c0_i32_0 = arith.constant 0 : i32
    return %arg0, %c0_i32 : i32, i32
  }
}

</mosaic_0001>

<bundles_post_ra>
// kernel: custom_loss_nep.1
= control target key start
LH: loop header
LB: loop body
LE: loop exit
PB: predicated region body
PF: predicated region fallthrough
CT: control target
= control target key end

     0   :  { %s626_s15 = smov 0   ;;  %s726_s0 = inlined_call_operand.vmem [shape: bf16[32,1024], index: 0, kind: input, shape index: {}]   ;;  %s727_s1 = inlined_call_operand.vmem [shape: f32[32,3], index: 1, kind: input, shape index: {}]   ;;  %s728_s2 = inlined_call_operand.vmem [shape: s32[32,1], index: 2, kind: input, shape index: {}]   ;;  %s729_s3 = inlined_call_operand.vmem [shape: f32[2,256], index: 3, kind: input, shape index: {}]   ;;  %s730_s4 = inlined_call_operand.vmem [shape: f32[32,128], index: 4, kind: output, shape index: {}]  }
   0x1 LB: > { %s544_s16 = sadd.s32 4294967295, %s597_s15   ;;  %p548_p0 = scmp.ge.s32.totalorder %s597_s15, 1  ;;  %s597_s15 = sphi %s626_s15, %s14_s15  }
   0x2   : > { %p186_p1 = scmp.lt.s32.totalorder %s597_s15, 3 }
   0x4   : > { %p187_p2 = pnand %p548_p0, %p186_p1 }
   0x5   : > { %s549_s17 = sshll.u32 (!%p187_p2), %s544_s16, 1 }
   0x6   : > { %190 = sbr.rel (%p187_p2) target bundleno = 446 (0x1be), region = 36  ;;  %p224_p3 = scmp.lt.s32.totalorder (!%p187_p2), %s549_s17, 3 }
   0xb   : > { %v599_v0 = vmov 0   ;;  %s736_s17 = smov (!%p224_p3, %s549_s17), 3  ;;  %vm252_vm0 = vcmask 23552  }
   0xc   : > { %576 = vset.pattern.permute.xlu0 %v599_v0  ;;  %577 = vset.pattern.permute.xlu1 %v599_v0  ;;  %s634_s18 = sshll.u32 %s736_s17, 3  ;;  %s565_s19 = sshll.u32 %s736_s17, 5 }
   0xd   : > { %578 = vset.pattern.permute.xlu2 %v599_v0  ;;  %s234_s22 = scalar_lea.vmem %s727_s1, %s634_s18  ;;  %s228_s25 = scalar_lea.vmem %s726_s0, %s565_s19 }
   0xe   : > { %v643_v1 = vld [vmem:[%s234_s22] sm:$0xff]  ;;  %v304_v6 = vld [vmem:[%s228_s25 + $0x28] sm:$0xff]  ;;  %v314_v7 = vld [vmem:[%s228_s25 + $0x30] sm:$0xff]  ;;  %s240_s28 = scalar_lea.vmem %s728_s2, %s634_s18  ;;  %s246_s9 = scalar_lea.vmem %s730_s4, %s634_s18 }
   0xf   : > { %v298_v2 = vld [vmem:[%s228_s25 + $0x20] sm:$0xff]  ;;  %v253_v3 = vsel %vm252_vm0, %v643_v1, -inf  ;;  %v324_v8 = vld [vmem:[%s228_s25 + $0x38] sm:$0xff]  ;;  %v307_v9 = vunpack.c.l.bf16 %v304_v6  ;;  %v308_v10 = vunpack.c.h.bf16 %v304_v6  ;;  %v317_v11 = vunpack.c.l.bf16 %v314_v7  ;;  %v303_v14 = vld [vmem:[%s228_s25 + $0x8] sm:$0xff] }
  0x10   : > { %v301_v4 = vunpack.c.l.bf16 %v298_v2  ;;  %v302_v5 = vunpack.c.h.bf16 %v298_v2  ;;  %254 = vmax.xlane.f32.xlu2 %v253_v3  ;;  %v318_v12 = vunpack.c.h.bf16 %v314_v7  ;;  %v297_v13 = vld [vmem:[%s228_s25] sm:$0xff]  ;;  %v313_v15 = vld [vmem:[%s228_s25 + $0x10] sm:$0xff]  ;;  %v327_v16 = vunpack.c.l.bf16 %v324_v8  ;;  %v323_v20 = vld [vmem:[%s228_s25 + $0x18] sm:$0xff] }
  0x11   : > { %v328_v17 = vunpack.c.h.bf16 %v324_v8  ;;  %v299_v18 = vunpack.c.l.bf16 %v297_v13  ;;  %v300_v19 = vunpack.c.h.bf16 %v297_v13  ;;  %v647_v21 = vld [vmem:[%s234_s22 + $0x8] sm:$0xff]  ;;  %v305_v24 = vunpack.c.l.bf16 %v303_v14  ;;  %v671_v49 = vld [vmem:[%s240_s28] sm:$0xff] }
  0x12   : > { %v311_v22 = vadd.f32 %v307_v9, %v301_v4  ;;  %v312_v23 = vadd.f32 %v308_v10, %v302_v5  ;;  %v306_v25 = vunpack.c.h.bf16 %v303_v14  ;;  %v315_v26 = vunpack.c.l.bf16 %v313_v15  ;;  %v674_v50 = vld [vmem:[%s240_s28 + $0x8] sm:$0xff]  ;;  %v562_v13 = vld [vmem:[%s729_s3 + $0x1] ss:$2 sm:$0x3] }
  0x13   : > { %v316_v27 = vunpack.c.h.bf16 %v313_v15  ;;  %v325_v28 = vunpack.c.l.bf16 %v323_v20  ;;  %v326_v29 = vunpack.c.h.bf16 %v323_v20  ;;  %v309_v32 = vadd.f32 %v305_v24, %v299_v18 }
  0x14   : > { %v321_v30 = vadd.f32 %v317_v11, %v311_v22  ;;  %v322_v31 = vadd.f32 %v318_v12, %v312_v23  ;;  %v310_v33 = vadd.f32 %v306_v25, %v300_v19  ;;  %v256_v34 = vsel %vm252_vm0, %v647_v21, -inf }
  0x15   : > { %v319_v37 = vadd.f32 %v315_v26, %v309_v32  ;;  %vm438_vm15 = vcmp.eq.s32.totalorder %v671_v49, 2 }
  0x16   : > { %v331_v35 = vadd.f32 %v327_v16, %v321_v30  ;;  %v332_v36 = vadd.f32 %v328_v17, %v322_v31  ;;  %v320_v38 = vadd.f32 %v316_v27, %v310_v33  ;;  %v401_v16 = vld [vmem:[%s729_s3] ss:$2 sm:$0x3]  ;;  %v420_v27 = vperm.slane %v562_v13, 0 }
  0x17   : > { %v329_v41 = vadd.f32 %v325_v28, %v319_v37  ;;  %v421_v28 = vperm.slane %v562_v13, 1  ;;  %v404_v31 = vperm.slane %v401_v16, 1 }
  0x18   : > { %257 = vmax.xlane.f32.xlu2 %v256_v34  ;;  %v651_v39 = vmul.f32 0.25, %v331_v35  ;;  %v653_v40 = vmul.f32 0.25, %v332_v36  ;;  %v330_v42 = vadd.f32 %v326_v29, %v320_v38  ;;  %v403_v29 = vperm.slane %v401_v16, 0 }
  0x19   : > { %v657_v44 = vmul.f32 0.25, %v329_v41 }
  0x1a   : > { %v340_v43 = vmin.f32 %v651_v39, %v653_v40  ;;  %v659_v45 = vmul.f32 0.25, %v330_v42  ;;  %v346_v47 = vmax.f32 %v651_v39, %v653_v40 }
  0x1c   : > { %341 = vmin.xlane.f32.xlu1 %v340_v43  ;;  %v337_v46 = vmin.f32 %v657_v44, %v659_v45  ;;  %v343_v48 = vmax.f32 %v657_v44, %v659_v45  ;;  %v600_v43 = vmov 0.0  }
  0x1e   : > { %338 = vmin.xlane.f32.xlu0 %v337_v46 }
  0x24   : > { %347 = vmax.xlane.f32.xlu1 %v346_v47 }
  0x26   : > { %344 = vmax.xlane.f32.xlu0 %v343_v48 }
  0x3a   : > { %280 = vperm.xlu0 %576, %v671_v49  }
  0x3d   : > { %283 = vperm.xlu1 %577, %v674_v50  }
  0x83   : > { %v677_v51 = vpop.xlane.xlu2 %254 }
  0x84   : > { %v259_v52 = vsub.f32 %v643_v1, %v677_v51 }
  0x86   : > { %v261_v53 = vmul.f32 1.442695, %v259_v52 }
  0x88   : > { %579 = vpow2.f32 %v261_v53 }
  0x8b   : > { %v681_v54 = vpop.xlane.xlu2 %257 }
  0x8c   : > { %v260_v55 = vsub.f32 %v647_v21, %v681_v54 }
  0x8e   : > { %v580_v56 = vpop.eup %579  ;;  %v263_v57 = vmul.f32 1.442695, %v260_v55 }
  0x8f   : > { %v342_v58 = vpop.xlane.xlu1 %341  ;;  %v265_v59 = vsel %vm252_vm0, %v580_v56, 0.0 }
  0x90   : > { %581 = vpow2.f32 %v263_v57  ;;  %266 = vadd.xlane.f32.xlu2 %v265_v59  ;;  %v351_v17 = vsub.f32 %v651_v39, %v342_v58  ;;  %v352_v26 = vsub.f32 %v653_v40, %v342_v58 }
  0x91   : > { %v339_v60 = vpop.xlane.xlu0 %338 }
  0x92   : > { %v349_v33 = vsub.f32 %v657_v44, %v339_v60  ;;  %v350_v34 = vsub.f32 %v659_v45, %v339_v60 }
  0x96   : > { %v582_v61 = vpop.eup %581 }
  0x97   : > { %v348_v62 = vpop.xlane.xlu1 %347  ;;  %v268_v63 = vsel %vm252_vm0, %v582_v61, 0.0  ;;  %v277_v61 = vlaneseq }
  0x98   : > { %v354_v0 = vsub.f32 %v348_v62, %v342_v58  ;;  %269 = vadd.xlane.f32.xlu2 %v268_v63 }
  0x99   : > { %v345_v2 = vpop.xlane.xlu0 %344 }
  0x9a   : > { %v356_v3 = vadd.f32 1e-07, %v354_v0  ;;  %v353_v4 = vsub.f32 %v345_v2, %v339_v60  ;;  %v278_v0 = vand.u32 127, %v277_v61 }
  0x9c   : > { %583 = vrcp.f32 %v356_v3  ;;  %v355_v5 = vadd.f32 1e-07, %v353_v4  ;;  %v382_v9 = vand.u32 2147483647, %v356_v3  ;;  %v384_v10 = vand.u32 2147483648, %v356_v3 }
  0x9d   : > { %vm378_vm1 = vweird.f32 %v356_v3 }
  0x9e   : > { %585 = vrcp.f32 %v355_v5  ;;  %vm698_vm4 = vcmp.eq.f32.partialorder %v382_v9, 8.507059e+37  ;;  %v385_v20 = vor.u32 1.1754944e-38, %v384_v10  ;;  %v368_v22 = vand.u32 2147483648, %v355_v5 }
  0x9f   : > { %v366_v25 = vand.u32 2147483647, %v355_v5  ;;  %vm362_vm6 = vweird.f32 %v355_v5 }
  0xa0   : > { %v369_v36 = vor.u32 1.1754944e-38, %v368_v22 }
  0xa1   : > { %vm367_vm8 = vcmp.eq.f32.partialorder %v366_v25, 8.507059e+37 }
  0xa2   : > { %v584_v6 = vpop.eup %583 }
  0xa3   : > { %v374_v7 = vmul.f32 %v584_v6, %v356_v3  ;;  %vm379_vm2 = vweird.f32 %v584_v6 }
  0xa4   : > { %v586_v8 = vpop.eup %585  ;;  %vm694_vm3 = vmor %vm378_vm1, %vm379_vm2  ;;  %vm434_vm1 = vcmp.eq.s32.totalorder %v671_v49, 1  ;;  %vm435_vm2 = vcmp.eq.s32.totalorder %v674_v50, 1 }
  0xa5   : > { %v375_v11 = vsub.f32 1.0, %v374_v7  ;;  %v358_v12 = vmul.f32 %v586_v8, %v355_v5  ;;  %vm363_vm5 = vweird.f32 %v586_v8 }
  0xa6   : > { %vm364_vm7 = vmor %vm362_vm6, %vm363_vm5 }
  0xa7   : > { %v359_v14 = vsub.f32 1.0, %v358_v12  ;;  %v376_v15 = vmul.f32 %v584_v6, %v375_v11 }
  0xa9   : > { %v377_v23 = vadd.f32 %v584_v6, %v376_v15  ;;  %v360_v24 = vmul.f32 %v586_v8, %v359_v14 }
  0xab   : > { %v381_v30 = vsel %vm694_vm3, %v584_v6, %v377_v23  ;;  %v361_v32 = vadd.f32 %v586_v8, %v360_v24 }
  0xac   : > { %v386_v35 = vsel %vm698_vm4, %v385_v20, %v381_v30  ;;  %v281_v2 = vpop.permute.xlu0 %280 }
  0xad   : > { %v387_v37 = vmul.f32 %v386_v35, %v351_v17  ;;  %v388_v38 = vmul.f32 %v386_v35, %v352_v26  ;;  %v365_v39 = vsel %vm364_vm7, %v586_v8, %v361_v32  ;;  %vm285_vm13 = vcmp.eq.s32.totalorder %v278_v0, %v281_v2 }
  0xae   : > { %v370_v40 = vsel %vm367_vm8, %v369_v36, %v365_v39  ;;  %v287_v4 = vsel %vm285_vm13, %v643_v1, 0.0 }
  0xaf   : > { %vm391_vm9 = vcmp.gt.f32.partialorder %v387_v37, 0.5  ;;  %vm392_vm10 = vcmp.gt.f32.partialorder %v388_v38, 0.5  ;;  %v371_v41 = vmul.f32 %v370_v40, %v349_v33  ;;  %v372_v42 = vmul.f32 %v370_v40, %v350_v34  ;;  %v284_v5 = vpop.permute.xlu1 %283 }
  0xb0   : > { %v560_v46 = vsel %vm391_vm9, 1.0, %v600_v43  ;;  %v561_v47 = vsel %vm392_vm10, 1.0, %v600_v43  ;;  %v289_v6 = vsel %vm252_vm0, %v287_v4, 0.0  ;;  %vm286_vm14 = vcmp.eq.s32.totalorder %v278_v0, %v284_v5 }
  0xb1   : > { %v426_v44 = vmul.f32 %v560_v46, %v420_v27  ;;  %v427_v48 = vmul.f32 %v561_v47, %v421_v28  ;;  %v409_v45 = vmul.f32 %v560_v46, %v403_v29  ;;  %v410_v52 = vmul.f32 %v561_v47, %v404_v31 }
  0xb2   : > { %vm389_vm11 = vcmp.gt.f32.partialorder %v371_v41, 0.5  ;;  %vm390_vm12 = vcmp.gt.f32.partialorder %v372_v42, 0.5  ;;  %v288_v7 = vsel %vm286_vm14, %v647_v21, 0.0 }
  0xb3   : > { %v431_v53 = vadd.f32 %v427_v48, %v426_v44  ;;  %v414_v55 = vadd.f32 %v410_v52, %v409_v45  ;;  %v558_v56 = vsel %vm389_vm11, 1.0, %v600_v43  ;;  %v559_v57 = vsel %vm390_vm12, 1.0, %v600_v43 }
  0xb4   : > { %v424_v58 = vmul.f32 %v558_v56, %v420_v27  ;;  %v425_v59 = vmul.f32 %v559_v57, %v421_v28  ;;  %v407_v62 = vmul.f32 %v558_v56, %v403_v29  ;;  %v408_v63 = vmul.f32 %v559_v57, %v404_v31 }
  0xb5   : > { %432 = vadd.xlane.f32.xlu1 %v431_v53  ;;  %415 = vadd.xlane.f32.xlu0 %v414_v55  ;;  %v292_v8 = vsel %vm252_vm0, %v288_v7, 0.0  ;;  %vm439_vm0 = vcmp.eq.s32.totalorder %v674_v50, 2 }
  0xb6   : > { %v428_v60 = vadd.f32 %v425_v59, %v424_v58  ;;  %v411_v3 = vadd.f32 %v408_v63, %v407_v62 }
  0xb8   : > { %429 = vadd.xlane.f32.xlu2 %v428_v60 }
  0xc0   : > { %412 = vadd.xlane.f32.xlu2 %v411_v3 }
  0xc8   : > { %290 = vadd.xlane.f32.xlu2 %v289_v6 }
  0xd0   : > { %293 = vadd.xlane.f32.xlu2 %v292_v8 }
 0x103   : > { %v267_v9 = vpop.xlane.xlu2 %266 }
 0x104   : > { %587 = vlog2.f32 %v267_v9 }
 0x10a   : > { %v588_v12 = vpop.eup %587 }
 0x10b   : > { %v270_v10 = vpop.xlane.xlu2 %269  ;;  %v272_v14 = vmul.f32 0.6931472, %v588_v12 }
 0x10c   : > { %589 = vlog2.f32 %v270_v10 }
 0x10d   : > { %v275_v21 = vadd.f32 %v272_v14, %v677_v51 }
 0x112   : > { %v590_v18 = vpop.eup %589 }
 0x113   : > { %v274_v25 = vmul.f32 0.6931472, %v590_v18 }
 0x115   : > { %v276_v51 = vadd.f32 %v274_v25, %v681_v54 }
 0x128   : > { %v433_v16 = vpop.xlane.xlu1 %432  ;;  %v416_v23 = vpop.xlane.xlu0 %415 }
 0x129   : > { %v441_v22 = vsub.f32 1.0, %v433_v16  ;;  %v437_v28 = vsub.f32 1.0, %v416_v23 }
 0x12b   : > { %v430_v11 = vpop.xlane.xlu2 %429  ;;  %v443_v49 = vsel %vm439_vm0, %v441_v22, 0.0 }
 0x12c   : > { %v440_v15 = vsub.f32 1.0, %v430_v11  ;;  %v445_v30 = vsel %vm435_vm2, %v437_v28, %v443_v49 }
 0x12d   : > { %v449_v33 = vmul.f32 0.5, %v445_v30 }
 0x12e   : > { %v442_v17 = vsel %vm438_vm15, %v440_v15, 0.0 }
 0x133   : > { %v413_v13 = vpop.xlane.xlu2 %412 }
 0x134   : > { %v436_v1 = vsub.f32 1.0, %v413_v13 }
 0x136   : > { %v444_v19 = vsel %vm434_vm1, %v436_v1, %v442_v17 }
 0x137   : > { %v448_v26 = vmul.f32 0.5, %v444_v19 }
 0x13b   : > { %v291_v20 = vpop.xlane.xlu2 %290 }
 0x13c   : > { %v295_v24 = vsub.f32 %v275_v21, %v291_v20 }
 0x13e   : > { %v446_v27 = vmul.f32 0.5, %v295_v24 }
 0x140   : > { %v450_v29 = vadd.f32 %v448_v26, %v446_v27 }
 0x142   : > { %454 = vperm.xlu2 %578, %v450_v29  }
 0x143   : > { %v294_v31 = vpop.xlane.xlu2 %293 }
 0x144   : > { %v296_v32 = vsub.f32 %v276_v51, %v294_v31 }
 0x146   : > { %v447_v34 = vmul.f32 0.5, %v296_v32 }
 0x148   : > { %v451_v35 = vadd.f32 %v449_v33, %v447_v34 }
 0x14a   : > { %459 = vperm.xlu1 %577, %v451_v35  }
 0x19c   : > { %v455_v36 = vpop.permute.xlu2 %454 }
 0x19d   : > { %462 = vst [vmem:[%s246_s9] sm:$0xff] %v455_v36 }
 0x1bc   : > { %v460_v37 = vpop.permute.xlu1 %459 }
 0x1bd   : > { %463 = vst [vmem:[%s246_s9 + $0x8] sm:$0xff] %v460_v37 }
 0x1be PF: > { %s14_s15 = sadd.s32 1, %s597_s15  }
 0x1bf   : > { %p11_p4 = scmp.ge.s32.totalorder %s14_s15, 4  }
 0x1c1   :  { %13 = sbr.rel (!%p11_p4) target bundleno = 1 (0x1), region = 73 }

</bundles_post_ra>
